<compile_context>
chip_gen: v7x
topology: tpu7x:2x2x1
jax: 0.10.0
libtpu: 0.0.40
codegen_flags: <defaults>
</compile_context>

<pallas_src>
import functools

import jax
import jax.numpy as jnp
from jax.experimental import pallas as pl
from jax.experimental.pallas import tpu as pltpu

GAMMA = 2.0    # module default; the kernel hard-codes gamma=2 via squaring
ALPHA = 0.25
LANES = 128
SUBLANES = 8
MAX_BLOCK_ROWS = 2048   # (2048, 128) f32 = 1 MiB per input block


def _focal_kernel(x_ref, t_ref, o_ref, *, n_valid, block_rows):
    i = pl.program_id(0)

    pt = x_ref[...].astype(jnp.float32)
    tgt = t_ref[...].astype(jnp.float32)

    # In-kernel validity mask for the padded tail / out-of-bounds rows of the
    # final block (replaces the HBM-streamed mask tensor of the old version).
    row = jax.lax.broadcasted_iota(jnp.int32, (block_rows, LANES), 0)
    lane = jax.lax.broadcasted_iota(jnp.int32, (block_rows, LANES), 1)
    gidx = (i * block_rows + row) * LANES + lane
    valid = gidx < n_valid

    # Substitute safe values *before* the logs so padded / OOB garbage can
    # never produce inf/NaN that would poison the accumulation.
    pt = jnp.where(valid, pt, jnp.float32(0.5))
    tgt = jnp.where(valid, tgt, jnp.float32(0.0))

    one = jnp.float32(1.0)
    one_m_pt = one - pt
    # gamma == 2: explicit squares instead of ** 2.0 (pow -> exp+log on EUP).
    loss = (-ALPHA * (one_m_pt * one_m_pt) * tgt * jnp.log(pt)
            - (one - ALPHA) * (pt * pt) * (one - tgt) * jnp.log(one_m_pt))
    loss = jnp.where(valid, loss, jnp.float32(0.0))

    # Per-block partial sum folded to a single (8,128) tile: pure VPU adds
    # over sublane groups; no scalar reduction inside the pipelined loop.
    partial = jnp.sum(
        loss.reshape(block_rows // SUBLANES, SUBLANES, LANES), axis=0)
    o_ref[...] = partial.reshape(1, SUBLANES, LANES)


def bce_focal_loss_cup(_input, target):
    """Pallas implementation of BCEFocalLoss_cup.forward
    (gamma=2, alpha=0.25, reduction='elementwise_mean')."""
    assert _input.shape == target.shape
    n = _input.size

    x = _input.reshape(-1)
    t = target.reshape(-1)

    # Pad (only if needed) so the flat length is a multiple of 8*128 and the
    # reshape to (rows, 128) is layout-free.  Padded values are masked
    # in-kernel, so the pad content is irrelevant.
    tile = SUBLANES * LANES
    n_pad = pl.cdiv(n, tile) * tile
    pad = n_pad - n
    if pad:
        x = jnp.pad(x, (0, pad))
        t = jnp.pad(t, (0, pad))

    rows = n_pad // LANES
    block_rows = min(MAX_BLOCK_ROWS, rows)   # rows is a multiple of 8
    num_blocks = pl.cdiv(rows, block_rows)

    x2 = x.reshape(rows, LANES)
    t2 = t.reshape(rows, LANES)

    kernel = functools.partial(_focal_kernel, n_valid=n, block_rows=block_rows)
    in_spec = pl.BlockSpec((block_rows, LANES), lambda i: (i, 0))

    partials = pl.pallas_call(
        kernel,
        out_shape=jax.ShapeDtypeStruct((num_blocks, SUBLANES, LANES),
                                       jnp.float32),
        grid_spec=pltpu.PrefetchScalarGridSpec(
            num_scalar_prefetch=0,
            grid=(num_blocks,),
            in_specs=[in_spec, in_spec],
            out_specs=pl.BlockSpec((1, SUBLANES, LANES), lambda i: (i, 0, 0)),
        ),
        compiler_params=pltpu.CompilerParams(
            dimension_semantics=("parallel",)),
    )(x2, t2)

    # reduction='elementwise_mean': tiny final reduction in plain JAX.
    return jnp.sum(partials) / jnp.float32(n)


def _reference(_input, target, gamma=GAMMA, alpha=ALPHA):
    pt = _input.astype(jnp.float32)
    tgt = target.astype(jnp.float32)
    loss = (-alpha * (1 - pt) ** gamma * tgt * jnp.log(pt)
            - (1 - alpha) * pt ** gamma * (1 - tgt) * jnp.log(1 - pt))
    return jnp.mean(loss)


if __name__ == "__main__":
    key = jax.random.PRNGKey(0)
    k1, k2 = jax.random.split(key)

    B, C, H, W = 2, 4, 16, 16
    # _input are probabilities in (0, 1); target is a binary mask.
    _input = jax.random.uniform(k1, (B, C, H, W), jnp.float32,
                                minval=0.01, maxval=0.99)
    target = (jax.random.uniform(k2, (B, C, H, W), jnp.float32) > 0.5
              ).astype(jnp.float32)

    loss = jax.jit(bce_focal_loss_cup)(_input, target)
    jax.block_until_ready(loss)

    ref = _reference(_input, target)
    assert jnp.allclose(loss, ref, rtol=1e-5, atol=1e-6), (loss, ref)

    print("KERNEL_OK")
</pallas_src>

<mosaic_0001>
module attributes {stable_mosaic.version = 11 : i64} {
  func.func @_focal_kernel(%arg0: i32, %arg1: memref<16x128xf32, #tpu.memory_space<vmem>>, %arg2: memref<16x128xf32, #tpu.memory_space<vmem>>, %arg3: memref<1x8x128xf32, #tpu.memory_space<vmem>>) attributes {dimension_semantics = [#tpu.dimension_semantics<parallel>], iteration_bounds = array<i64: 1>, scalar_prefetch = 0 : i64, scratch_operands = 0 : i64, tpu.core_type = #tpu.core_type<tc>, window_params = [{transform_indices = @transform_0, window_bounds = array<i64: 16, 128>}, {transform_indices = @transform_1, window_bounds = array<i64: 16, 128>}, {transform_indices = @transform_2, window_bounds = array<i64: 1, 8, 128>}]} {
    %c0 = arith.constant 0 : index
    %c0_0 = arith.constant 0 : index
    %0 = vector.load %arg1[%c0, %c0_0] : memref<16x128xf32, #tpu.memory_space<vmem>>, vector<16x128xf32>
    %c0_1 = arith.constant 0 : index
    %c0_2 = arith.constant 0 : index
    %1 = vector.load %arg2[%c0_1, %c0_2] : memref<16x128xf32, #tpu.memory_space<vmem>>, vector<16x128xf32>
    %2 = tpu.iota {dimensions = array<i32: 0>} : vector<16x128xi32>
    %3 = tpu.iota {dimensions = array<i32: 1>} : vector<16x128xi32>
    %c16_i32 = arith.constant 16 : i32
    %4 = arith.muli %arg0, %c16_i32 : i32
    %5 = vector.broadcast %4 : i32 to vector<16x128xi32>
    %6 = arith.addi %5, %2 : vector<16x128xi32>
    %c128_i32 = arith.constant 128 : i32
    %7 = vector.broadcast %c128_i32 : i32 to vector<16x128xi32>
    %8 = arith.muli %6, %7 : vector<16x128xi32>
    %9 = arith.addi %8, %3 : vector<16x128xi32>
    %c2048_i32 = arith.constant 2048 : i32
    %10 = vector.broadcast %c2048_i32 : i32 to vector<16x128xi32>
    %11 = arith.cmpi slt, %9, %10 : vector<16x128xi32>
    %cst = arith.constant 5.000000e-01 : f32
    %12 = vector.broadcast %cst : f32 to vector<16x128xf32>
    %13 = arith.select %11, %0, %12 : vector<16x128xi1>, vector<16x128xf32>
    %cst_3 = arith.constant 0.000000e+00 : f32
    %14 = vector.broadcast %cst_3 : f32 to vector<16x128xf32>
    %15 = arith.select %11, %1, %14 : vector<16x128xi1>, vector<16x128xf32>
    %cst_4 = arith.constant 1.000000e+00 : f32
    %16 = vector.broadcast %cst_4 : f32 to vector<16x128xf32>
    %17 = arith.subf %16, %13 : vector<16x128xf32>
    %18 = arith.mulf %17, %17 : vector<16x128xf32>
    %cst_5 = arith.constant -2.500000e-01 : f32
    %19 = vector.broadcast %cst_5 : f32 to vector<16x128xf32>
    %20 = arith.mulf %19, %18 : vector<16x128xf32>
    %21 = arith.mulf %20, %15 : vector<16x128xf32>
    %22 = math.log %13 : vector<16x128xf32>
    %23 = arith.mulf %21, %22 : vector<16x128xf32>
    %cst_6 = arith.constant 1.000000e+00 : f32
    %cst_7 = arith.constant 2.500000e-01 : f32
    %24 = arith.subf %cst_6, %cst_7 : f32
    %25 = arith.mulf %13, %13 : vector<16x128xf32>
    %26 = vector.broadcast %24 : f32 to vector<16x128xf32>
    %27 = arith.mulf %26, %25 : vector<16x128xf32>
    %cst_8 = arith.constant 1.000000e+00 : f32
    %28 = vector.broadcast %cst_8 : f32 to vector<16x128xf32>
    %29 = arith.subf %28, %15 : vector<16x128xf32>
    %30 = arith.mulf %27, %29 : vector<16x128xf32>
    %31 = math.log %17 : vector<16x128xf32>
    %32 = arith.mulf %30, %31 : vector<16x128xf32>
    %33 = arith.subf %23, %32 : vector<16x128xf32>
    %cst_9 = arith.constant 0.000000e+00 : f32
    %34 = vector.broadcast %cst_9 : f32 to vector<16x128xf32>
    %35 = arith.select %11, %33, %34 : vector<16x128xi1>, vector<16x128xf32>
    %36 = vector.shape_cast %35 : vector<16x128xf32> to vector<2x8x128xf32>
    %cst_10 = arith.constant dense<0.000000e+00> : vector<8x128xf32>
    %37 = vector.multi_reduction <add>, %36, %cst_10 [0] : vector<2x8x128xf32> to vector<8x128xf32>
    %38 = vector.shape_cast %37 : vector<8x128xf32> to vector<1x8x128xf32>
    %c0_11 = arith.constant 0 : index
    %c0_12 = arith.constant 0 : index
    %c0_13 = arith.constant 0 : index
    %39 = vector.load %arg3[%c0_11, %c0_12, %c0_13] : memref<1x8x128xf32, #tpu.memory_space<vmem>>, vector<1x8x128xf32>
    tpu.vector_store %arg3[%c0_11, %c0_12, %c0_13], %38 {strides = array<i32>} : memref<1x8x128xf32, #tpu.memory_space<vmem>>, vector<1x8x128xf32>,
    return
  }
  func.func @transform_0(%arg0: i32) -> (i32, i32) {
    %c0_i32 = arith.constant 0 : i32
    %c0_i32_0 = arith.constant 0 : i32
    return %arg0, %c0_i32 : i32, i32
  }
  func.func @transform_1(%arg0: i32) -> (i32, i32) {
    %c0_i32 = arith.constant 0 : i32
    %c0_i32_0 = arith.constant 0 : i32
    return %arg0, %c0_i32 : i32, i32
  }
  func.func @transform_2(%arg0: i32) -> (i32, i32, i32) {
    %c0_i32 = arith.constant 0 : i32
    %c0_i32_0 = arith.constant 0 : i32
    %c0_i32_1 = arith.constant 0 : i32
    return %arg0, %c0_i32, %c0_i32_0 : i32, i32, i32
  }
}

</mosaic_0001>

<bundles_post_ra>
// kernel: bce_focal_loss_cup.1
= control target key start
LH: loop header
LB: loop body
LE: loop exit
PB: predicated region body
PF: predicated region fallthrough
CT: control target
= control target key end

     0   :  { %v15_v0 = vlaneseq  ;;  %s116_s0 = inlined_call_operand.vmem [shape: f32[16,128], index: 0, kind: input, shape index: {}]   ;;  %s117_s1 = inlined_call_operand.vmem [shape: f32[16,128], index: 1, kind: input, shape index: {}]   ;;  %s118_s2 = inlined_call_operand.vmem [shape: f32[1,8,128], index: 2, kind: output, shape index: {}]  }
   0x1   :  { %v11_v5 = vld [vmem:[%s116_s0] sm:$0xff]  ;;  %v12_v8 = vld [vmem:[%s116_s0 + $0x8] sm:$0xff] }
   0x2   :  { %v16_v1 = vshrl.u32 %v15_v0, 7  ;;  %v19_v2 = vand.u32 127, %v15_v0  ;;  %v13_v13 = vld [vmem:[%s117_s1] sm:$0xff]  ;;  %v14_v16 = vld [vmem:[%s117_s1 + $0x8] sm:$0xff] }
   0x4   :  { %v17_v3 = vadd.s32 8, %v16_v1  ;;  %v24_v4 = vmul.u32 128, %v16_v1 }
   0x6   :  { %v25_v6 = vmul.u32 128, %v17_v3  ;;  %v26_v7 = vadd.s32 %v24_v4, %v19_v2 }
   0x8   :  { %v27_v9 = vadd.s32 %v25_v6, %v19_v2  ;;  %vm28_vm0 = vcmp.lt.s32.totalorder %v26_v7, 2048 }
   0x9   :  { %v30_v10 = vsel %vm28_vm0, %v11_v5, 0.5  ;;  %v32_v19 = vsel %vm28_vm0, %v13_v13, 0.0 }
   0xa   :  { %vm29_vm1 = vcmp.lt.s32.totalorder %v27_v9, 2048  ;;  %v34_v11 = vsub.f32 1.0, %v30_v10  ;;  %72 = vlog2.f32 %v30_v10  ;;  %v48_v18 = vmul.f32 %v30_v10, %v30_v10 }
   0xb   :  { %v31_v12 = vsel %vm29_vm1, %v12_v8, 0.5  ;;  %v33_v21 = vsel %vm29_vm1, %v14_v16, 0.0  ;;  %v52_v25 = vsub.f32 1.0, %v32_v19 }
   0xc   :  { %v35_v14 = vsub.f32 1.0, %v31_v12  ;;  %v36_v15 = vmul.f32 %v34_v11, %v34_v11  ;;  %74 = vlog2.f32 %v31_v12  ;;  %v49_v20 = vmul.f32 %v31_v12, %v31_v12 }
   0xd   :  { %76 = vlog2.f32 %v34_v11  ;;  %v50_v24 = vmul.f32 0.75, %v48_v18  ;;  %v53_v27 = vsub.f32 1.0, %v33_v21 }
   0xe   :  { %v37_v17 = vmul.f32 %v35_v14, %v35_v14  ;;  %78 = vlog2.f32 %v35_v14  ;;  %v38_v22 = vmul.f32 -0.25, %v36_v15  ;;  %v51_v26 = vmul.f32 0.75, %v49_v20 }
   0xf   :  { %v54_v33 = vmul.f32 %v52_v25, %v50_v24 }
  0x10   :  { %v39_v23 = vmul.f32 -0.25, %v37_v17  ;;  %v40_v29 = vmul.f32 %v38_v22, %v32_v19  ;;  %v55_v36 = vmul.f32 %v53_v27, %v51_v26 }
  0x12   :  { %v41_v30 = vmul.f32 %v39_v23, %v33_v21 }
  0x14   :  { %v73_v28 = vpop.eup %72 }
  0x15   :  { %v43_v31 = vmul.f32 0.6931472, %v73_v28 }
  0x16   :  { %v75_v32 = vpop.eup %74 }
  0x17   :  { %v77_v34 = vpop.eup %76  ;;  %v45_v35 = vmul.f32 0.6931472, %v75_v32  ;;  %v46_v38 = vmul.f32 %v43_v31, %v40_v29 }
  0x18   :  { %v79_v37 = vpop.eup %78  ;;  %v57_v39 = vmul.f32 0.6931472, %v77_v34 }
  0x19   :  { %v47_v40 = vmul.f32 %v45_v35, %v41_v30  ;;  %v59_v41 = vmul.f32 0.6931472, %v79_v37 }
  0x1a   :  { %v60_v42 = vmul.f32 %v57_v39, %v54_v33 }
  0x1b   :  { %v61_v43 = vmul.f32 %v59_v41, %v55_v36 }
  0x1c   :  { %v62_v44 = vsub.f32 %v46_v38, %v60_v42 }
  0x1d   :  { %v63_v45 = vsub.f32 %v47_v40, %v61_v43 }
  0x1e   :  { %v64_v46 = vsel %vm28_vm0, %v62_v44, 0.0 }
  0x1f   :  { %v65_v47 = vsel %vm29_vm1, %v63_v45, 0.0 }
  0x20   :  { %v66_v48 = vadd.f32 %v65_v47, %v64_v46 }
  0x22   :  { %67 = vst [vmem:[%s118_s2] sm:$0xff] %v66_v48 }

</bundles_post_ra>
